<compile_context>
chip_gen: v5e
topology: v5e:2x2
jax: 0.10.0
libtpu: 0.0.40
codegen_flags: <defaults>
</compile_context>

<pallas_src>
import jax
import jax.numpy as jnp
from jax import lax
from jax.experimental import pallas as pl
from jax.experimental.pallas import tpu as pltpu


def fuse_location_weights(w_conv, w_dense, *, dtype=jnp.float32):
    """Fuse Conv1d weight (F, C, K) and Linear weight (A, F) into (K*C, A).

    Both ops are linear, so
        y[b, t, a] = sum_{k, c} W_eff[k*C + c, a] * x_pad[b, c, t + k].
    Call ONCE (weights are fixed across decoder steps) and reuse the result.
    """
    Fch, C, K = w_conv.shape
    A = w_dense.shape[0]
    w_eff = jnp.einsum("fck,af->kca", w_conv, w_dense).reshape(K * C, A)
    return w_eff.astype(dtype)


def _choose_time_tile(T, row_tile):
    """Per-step time tile.

    Prefer a tile that divides T (no time padding, no wrapper slice copy) and
    is a multiple of 8 when it actually tiles T (sublane rule).  When
    T <= row_tile the whole sequence is one full-dim tile per batch; v7x's
    second TensorCore still gets work via the parallel batch axis (and when
    B == 1 and T <= row_tile the total work is too small for splitting to
    matter).
    """
    if T <= row_tile:
        return T
    for cand in range(row_tile, 7, -8):       # largest mult-of-8 divisor
        if T % cand == 0:
            return cand
    return row_tile                           # fall back: needs time padding


def location_layer_forward(attention_weights_cat, w_eff, *, row_tile=1024,
                           use_bf16=False):
    """attention_weights_cat: (B, 2, T) float32
       w_eff: (K*2, A) fused weight from fuse_location_weights()
       returns: (B, T, A) == LocationLayer.forward(x)
    """
    B, C, T = attention_weights_cat.shape
    KC, A = w_eff.shape
    assert KC % C == 0
    K = KC // C
    assert K % 2 == 1, "LocationLayer uses 'same' padding with an odd kernel"
    assert row_tile % 8 == 0 and row_tile > 0
    pad = (K - 1) // 2

    tt = _choose_time_tile(T, row_tile)
    n_t = pl.cdiv(T, tt)
    t_pad = n_t * tt                          # == T unless no nice divisor existed
    Tp = t_pad + 2 * pad

    # ---- layout plumbing only (no K-fold duplication of the input) ----
    x_tm = jnp.transpose(attention_weights_cat, (0, 2, 1))             # (B, T, C)
    x_tm = jnp.pad(x_tm, ((0, 0), (pad, pad + (t_pad - T)), (0, 0)))   # (B, Tp, C)

    compute_dtype = jnp.bfloat16 if use_bf16 else jnp.float32
    x_in = x_tm.astype(compute_dtype)
    w_in = w_eff.astype(compute_dtype)

    def kernel(x_ref, w_ref, o_ref):
        # x_ref: (1, Tp, C)  whole padded sequence of batch b (block index only
        #                    depends on b -> re-DMA'd only when b changes).
        # w_ref: (K*C, A)    fused conv+dense weight (block index constant).
        # o_ref: (1, tt, A)  output tile; A is the full lane dim (no padding).
        if n_t == 1:
            t0 = 0                                        # fully static path
        else:
            t0 = pl.multiple_of(pl.program_id(1) * tt, 8)  # tt % 8 == 0 here
        halo = x_ref[0, pl.ds(t0, tt + K - 1), :]          # (tt + K - 1, C)
        acc = jnp.zeros((tt, A), jnp.float32)
        for k in range(K):                                 # static unroll
            acc += jnp.dot(halo[k:k + tt, :],
                           w_ref[k * C:(k + 1) * C, :],
                           preferred_element_type=jnp.float32)
        o_ref[0, :, :] = acc.astype(o_ref.dtype)

    out = pl.pallas_call(
        kernel,
        out_shape=jax.ShapeDtypeStruct((B, t_pad, A), jnp.float32),
        grid_spec=pltpu.PrefetchScalarGridSpec(
            num_scalar_prefetch=0,
            grid=(B, n_t),
            in_specs=[
                pl.BlockSpec((1, Tp, C), lambda b, i: (b, 0, 0)),
                pl.BlockSpec((KC, A), lambda b, i: (0, 0)),
            ],
            out_specs=pl.BlockSpec((1, tt, A), lambda b, i: (b, i, 0)),
        ),
        compiler_params=pltpu.CompilerParams(
            # Every grid point writes a distinct output block, so both axes
            # are parallel; with B >= 2 (or T > row_tile) v7x's two
            # TensorCores each get at least one tile.
            dimension_semantics=("parallel", "parallel")),
    )(x_in, w_in)

    if t_pad != T:                           # only when no divisor tile existed
        out = out[:, :T, :]
    return out


def _reference(attention_weights_cat, w_conv, w_dense):
    # Pure-JAX reference mirroring PyTorch conv1d + transpose + linear.
    pad = (w_conv.shape[-1] - 1) // 2
    conv = lax.conv_general_dilated(
        attention_weights_cat, w_conv,
        window_strides=(1,), padding=[(pad, pad)],
        dimension_numbers=("NCH", "OIH", "NCH"),
    )                                                  # (B, F, T)
    proc = jnp.transpose(conv, (0, 2, 1))              # (B, T, F)
    return jnp.einsum("btf,af->bta", proc, w_dense)    # (B, T, A)


if __name__ == "__main__":
    # Small shapes consistent with LocationLayer:
    #   attention_n_filters=8, attention_kernel_size=3, attention_dim=32
    B, T = 2, 16
    n_filters, kernel_size, attention_dim = 8, 3, 32

    key = jax.random.PRNGKey(0)
    k_x, k_conv, k_dense = jax.random.split(key, 3)

    attention_weights_cat = jax.random.normal(k_x, (B, 2, T), dtype=jnp.float32)
    w_conv = 0.1 * jax.random.normal(
        k_conv, (n_filters, 2, kernel_size), dtype=jnp.float32)   # Conv1d weight
    w_dense = 0.1 * jax.random.normal(
        k_dense, (attention_dim, n_filters), dtype=jnp.float32)   # Linear weight

    # Weight fusion hoisted out of the per-call hot path (weights are fixed
    # across decoder steps) -- computed once here and reused.
    w_eff = fuse_location_weights(w_conv, w_dense)

    out = location_layer_forward(attention_weights_cat, w_eff)
    out = jax.block_until_ready(out)

    ref = _reference(attention_weights_cat, w_conv, w_dense)
    assert out.shape == (B, T, attention_dim)
    assert jnp.allclose(out, ref, atol=1e-5, rtol=1e-5)

    print("KERNEL_OK")
</pallas_src>

<mosaic_0001>
module attributes {stable_mosaic.version = 11 : i64} {
  func.func @kernel(%arg0: i32, %arg1: i32, %arg2: memref<1x18x2xf32, #tpu.memory_space<vmem>>, %arg3: memref<6x32xf32, #tpu.memory_space<vmem>>, %arg4: memref<1x16x32xf32, #tpu.memory_space<vmem>>) attributes {dimension_semantics = [#tpu.dimension_semantics<parallel>, #tpu.dimension_semantics<parallel>], iteration_bounds = array<i64: 2, 1>, scalar_prefetch = 0 : i64, scratch_operands = 0 : i64, tpu.core_type = #tpu.core_type<tc>, window_params = [{transform_indices = @transform_0, window_bounds = array<i64: 1, 18, 2>}, {pipeline_mode = #tpu.pipeline_mode<synchronous>, transform_indices = @transform_1, window_bounds = array<i64: 6, 32>}, {transform_indices = @transform_2, window_bounds = array<i64: 1, 16, 32>}]} {
    %c0 = arith.constant 0 : index
    %c0_0 = arith.constant 0 : index
    %c0_1 = arith.constant 0 : index
    %0 = vector.load %arg2[%c0, %c0_0, %c0_1] : memref<1x18x2xf32, #tpu.memory_space<vmem>>, vector<1x18x2xf32>
    %1 = vector.shape_cast %0 : vector<1x18x2xf32> to vector<18x2xf32>
    %cst = arith.constant 0.000000e+00 : f32
    %2 = vector.broadcast %cst : f32 to vector<16x32xf32>
    %3 = vector.extract_strided_slice %1 {offsets = [0, 0], sizes = [16, 2], strides = [1, 1]} : vector<18x2xf32> to vector<16x2xf32>
    %c0_2 = arith.constant 0 : index
    %c0_3 = arith.constant 0 : index
    %4 = vector.load %arg3[%c0_2, %c0_3] : memref<6x32xf32, #tpu.memory_space<vmem>>, vector<2x32xf32>
    %cst_4 = arith.constant dense<0.000000e+00> : vector<16x32xf32>
    %5 = tpu.matmul %3, %4, %cst_4 {dimension_numbers = #tpu.dot_dimension_numbers<[1], [0], [0], [1], [0, 0, 1, 1], [], []>} : vector<16x2xf32>, vector<2x32xf32>, vector<16x32xf32> -> vector<16x32xf32>
    %6 = arith.addf %2, %5 : vector<16x32xf32>
    %7 = vector.extract_strided_slice %1 {offsets = [1, 0], sizes = [16, 2], strides = [1, 1]} : vector<18x2xf32> to vector<16x2xf32>
    %c2 = arith.constant 2 : index
    %c0_5 = arith.constant 0 : index
    %8 = vector.load %arg3[%c2, %c0_5] : memref<6x32xf32, #tpu.memory_space<vmem>>, vector<2x32xf32>
    %cst_6 = arith.constant dense<0.000000e+00> : vector<16x32xf32>
    %9 = tpu.matmul %7, %8, %cst_6 {dimension_numbers = #tpu.dot_dimension_numbers<[1], [0], [0], [1], [0, 0, 1, 1], [], []>} : vector<16x2xf32>, vector<2x32xf32>, vector<16x32xf32> -> vector<16x32xf32>
    %10 = arith.addf %6, %9 : vector<16x32xf32>
    %11 = vector.extract_strided_slice %1 {offsets = [2, 0], sizes = [16, 2], strides = [1, 1]} : vector<18x2xf32> to vector<16x2xf32>
    %c4 = arith.constant 4 : index
    %c0_7 = arith.constant 0 : index
    %12 = vector.load %arg3[%c4, %c0_7] : memref<6x32xf32, #tpu.memory_space<vmem>>, vector<2x32xf32>
    %cst_8 = arith.constant dense<0.000000e+00> : vector<16x32xf32>
    %13 = tpu.matmul %11, %12, %cst_8 {dimension_numbers = #tpu.dot_dimension_numbers<[1], [0], [0], [1], [0, 0, 1, 1], [], []>} : vector<16x2xf32>, vector<2x32xf32>, vector<16x32xf32> -> vector<16x32xf32>
    %14 = arith.addf %10, %13 : vector<16x32xf32>
    %c0_9 = arith.constant 0 : index
    %c0_10 = arith.constant 0 : index
    %c0_11 = arith.constant 0 : index
    %15 = vector.load %arg4[%c0_9, %c0_10, %c0_11] : memref<1x16x32xf32, #tpu.memory_space<vmem>>, vector<1x16x32xf32>
    %16 = vector.shape_cast %15 : vector<1x16x32xf32> to vector<16x32xf32>
    %17 = vector.shape_cast %14 : vector<16x32xf32> to vector<1x16x32xf32>
    tpu.vector_store %arg4[%c0_9, %c0_10, %c0_11], %17 {strides = array<i32>} : memref<1x16x32xf32, #tpu.memory_space<vmem>>, vector<1x16x32xf32>,
    return
  }
  func.func @transform_0(%arg0: i32, %arg1: i32) -> (i32, i32, i32) {
    %c0_i32 = arith.constant 0 : i32
    %c0_i32_0 = arith.constant 0 : i32
    %c0_i32_1 = arith.constant 0 : i32
    return %arg0, %c0_i32, %c0_i32_0 : i32, i32, i32
  }
  func.func @transform_1(%arg0: i32, %arg1: i32) -> (i32, i32) {
    %c0_i32 = arith.constant 0 : i32
    %c0_i32_0 = arith.constant 0 : i32
    %c0_i32_1 = arith.constant 0 : i32
    return %c0_i32, %c0_i32_0 : i32, i32
  }
  func.func @transform_2(%arg0: i32, %arg1: i32) -> (i32, i32, i32) {
    %c0_i32 = arith.constant 0 : i32
    %c0_i32_0 = arith.constant 0 : i32
    return %arg0, %arg1, %c0_i32 : i32, i32, i32
  }
}

</mosaic_0001>

<bundles_post_ra>
// kernel: tpu_custom_call.1
= control target key start
LH: loop header
LB: loop body
LE: loop exit
PB: predicated region body
PF: predicated region fallthrough
CT: control target
= control target key end

     0   :  { %7 = vsyncpa [#allocation3], 0  ;;  %s658_s0 = inlined_call_operand.vmem [shape: f32[2,18,2], index: 0, kind: input, shape index: {}]   ;;  %s659_s1 = inlined_call_operand.vmem [shape: f32[6,32], index: 1, kind: input, shape index: {}]   ;;  %s660_s2 = inlined_call_operand.hbm [shape: f32[2,16,32], index: 2, kind: output, shape index: {}]  }
   0x1   :  { %9 = vsyncpa [#allocation3 + $0x1], 0  ;;  %s544_s9 = smov 0   ;;  %s546_s10 = smov 0  }
   0x2   :  { %s548_s11 = smov 0   ;;  %s550_s12 = smov 0  }
   0x3   :  { %s552_s13 = smov 0   ;;  %s554_s14 = smov 0  }
   0x4 LB: > { %s366_s15 = sadd.s32 4294967295, %s525_s14   ;;  %s367_s16 = sadd.s32 4294967294, %s525_s14   ;;  %s525_s14 = sphi %s554_s14, %s15_s14   ;;  %s521_s13 = sphi %s552_s13, %s667_s13   ;;  %s517_s12 = sphi %s550_s12, %s666_s12   ;;  %s513_s11 = sphi %s548_s11, %s665_s11   ;;  %s509_s10 = sphi %s546_s10, %s664_s10   ;;  %s505_s9 = sphi %s544_s9, %s663_s9  }
   0x5   : > { %s27_s17 = sadd.s32 1, %s521_s13  ;;  %s83_s18 = sadd.s32 1, %s513_s11 }
   0x6   : > { %p29_p0 = scmp.ge.s32.totalorder %s27_s17, 2  ;;  %p93_p1 = scmp.ne.s32.totalorder %s513_s11, %s509_s10 }
   0x7   : > { %p94_p2 = scmp.eq.s32.totalorder %s366_s15, 1  ;;  %p99_p3 = scmp.ne.s32.totalorder %s509_s10, %s505_s9 }
   0x8   : > { %s669_s17 = smov (%p29_p0, %s27_s17), 0  ;;  %p100_p5 = scmp.eq.s32.totalorder %s367_s16, 1 }
   0x9   : > { %p584_p4 = por %p94_p2, %p93_p1  ;;  %s78_s20 = ssub.s32 %s521_s13, %s669_s17 }
   0xa   : > { %p370_p6 = scmp.ge.s32.totalorder %s525_s14, 1  ;;  %p81_p7 = scmp.eq.s32.totalorder %s78_s20, 0 }
   0xb   : > { %p591_p8 = por %p100_p5, %p99_p3  ;;  %p129_p9 = scmp.lt.s32.totalorder %s525_s14, 3 }
   0xc   : > { %s597_s22 = scalar_select %p81_p7, %s513_s11, %s83_s18  }
   0xd   : > { %p130_p10 = pnand %p370_p6, %p129_p9 }
   0xe   : > { %p151_p11 = scmp.lt.s32.totalorder (!%p130_p10), %s517_s12, 1  ;;  %s148_s6 = sand.u32 (!%p130_p10), 1, %s509_s10  }
   0xf   : > { %133 = sbr.rel (%p130_p10) target bundleno = 175 (0xaf), region = 28  ;;  %s371_s7 = sshll.u32 (!%p130_p10), %s148_s6, 4 }
  0x10   : > { %s387_s8 = sshll.u32 (!%p130_p10), %s517_s12, 4  ;;  %s150_s20 = scalar_lea.vmem (!%p130_p10), [#allocation2], %s371_s7 }
  0x11   : > { %s289_s18 = scalar_lea.hbm (!%p130_p10), %s660_s2, %s387_s8  ;;  %s290_s23 = sshll.u32 (!%p130_p10), %s150_s20, 4  ;;  %s291_s23 = int_to_ptr.vmem [resolvable:$true] %s290_s23 }
  0x12   : > { %s292_s24 = sshll.u32 (!%p130_p10), %s289_s18, 4  ;;  %s293_s24 = int_to_ptr.hbm [resolvable:$true] %s292_s24 }
  0x13   : > { %s461_s25 = sshra.s32 (!%p130_p10), %s293_s24, 4  ;;  %s462_s25 = int_to_ptr.hbm [resolvable:$true] %s461_s25 }
  0x14   : > { %vm176_vm0 = vcmask 1041408   ;;  %v233_v0 = vld [vmem:[%s659_s1 + $0x4] sm:$0x3]  ;;  %v161_v1 = vld [vmem:[%s659_s1 + $0x2] sm:$0x3]  ;;  %s152_s29 = scalar_select %p151_p11, %s517_s12, 1 }
  0x15   : > { %379 = vmatpush.msk.msra.mxu2 %vm176_vm0, %v233_v0  ;;  %v160_v2 = vld [vmem:[%s659_s1] sm:$0x3]  ;;  %373 = vmatpush.msk.msra.mxu0 %vm176_vm0, %v161_v1  ;;  %vm171_vm1 = vcmask 15360   ;;  %vm234_vm2 = vcmask 1045504   ;;  %vm165_vm3 = vcmask 1046528   ;;  %vm272_vm4 = vcmask 261120   ;;  %p468_p1 = scmp.lt.s32.totalorder %s462_s25, %s660_s2 }
  0x16   : > { %376 = vmatpush.msk.msra.mxu1 %vm176_vm0, %v160_v2  ;;  %388 = vmatpush.msk.msra.mxu3 %vm176_vm0, %v161_v1  ;;  %s389_s30 = smul.u32 24, %s152_s29  ;;  %s276_s12 = scalar_lea.sflag [#allocation3], %s148_s6 }
  0x17   : > { %s463_s26 = scalar_lea.hbm %s462_s25, 16  ;;  %s467_s29 = scalar_lea.hbm %s660_s2, 32 }
  0x18   : > { %s155_s5 = scalar_lea.vmem %s658_s0, %s389_s30  ;;  %p464_p12 = scmp.ne.s32.totalorder %s462_s25, %s463_s26 }
  0x19   : > { %v157_v3 = vld [vmem:[%s155_s5] sm:$0xff]  ;;  %v158_v4 = vld [vmem:[%s155_s5 + $0x8] sm:$0xff]  ;;  %v159_v5 = vld [vmem:[%s155_s5 + $0x10] sm:$0x3]  ;;  %p469_p2 = scmp.lt.s32.totalorder %s467_s29, %s463_s26 }
  0x1a   : > { %v235_v6 = vrot.slane %v157_v3, 2  ;;  %v236_v7 = vrot.slane %v158_v4, 2  ;;  %v166_v8 = vrot.slane %v157_v3, 1  ;;  %v167_v9 = vrot.slane %v158_v4, 1  ;;  %377 = vmatmul.msk.f32.vlgmr.msra.gmra.mxu1 %vm171_vm1, %v157_v3  ;;  %p465_p13 = pnand %p464_p12, %p584_p4 }
  0x1b   : > { %v169_v10 = vrot.slane %v159_v5, 1  ;;  %v238_v14 = vrot.slane %v159_v5, 2  ;;  %p470_p3 = por %p469_p2, %p468_p1 }
  0x1c   : > { %v237_v11 = vsel %vm234_vm2, %v235_v6, %v236_v7  ;;  %v168_v12 = vsel %vm165_vm3, %v166_v8, %v167_v9  ;;  %p466_p0 = pneg %p465_p13 }
  0x1d   : > { %380 = vmatmul.msk.f32.vlgmr.msra.gmra.mxu2 %vm171_vm1, %v237_v11  ;;  %374 = vmatmul.msk.f32.vlgmr.msra.gmra.mxu0 %vm171_vm1, %v168_v12  ;;  %v170_v13 = vsel %vm165_vm3, %v167_v9, %v169_v10  ;;  %v239_v15 = vsel %vm234_vm2, %v236_v7, %v238_v14 }
  0x1e   : > { %375 = vmatmul.msk.f32.vlgmr.msra.gmra.mxu3 %vm171_vm1, %v170_v13  ;;  %p471_p5 = pnand %p470_p3, %p466_p0 }
  0x22   : > { %378 = vmatmul.msk.f32.gmra.mxu1 %vm171_vm1, %v158_v4 }
  0x25   : > { %381 = vmatmul.msk.f32.gmra.mxu2 %vm171_vm1, %v239_v15 }
  0x97   : > { %v227_v16 = vpop.f32.mrf.mxu1 }
  0x9a   : > { %v197_v17 = vpop.f32.mrf.mxu0 }
  0x9b   : > { %v228_v18 = vadd.f32 %v227_v16, %v197_v17 }
  0x9f   : > { %v230_v22 = vpop.f32.mrf.mxu1 }
  0xa0   : > { %v264_v19 = vpop.f32.mrf.mxu2 }
  0xa1   : > { %v270_v20 = vadd.f32 %v264_v19, %v228_v18  ;;  %v200_v21 = vpop.f32.mrf.mxu3 }
  0xa2   : > { %v231_v23 = vadd.f32 %v230_v22, %v200_v21 }
  0xa3   : > { %273 = vst.msk [vmem:[%s150_s20] sm:$0xff] %vm272_vm4, %v270_v20 }
  0xa8   : > { %v267_v24 = vpop.f32.mrf.mxu2 }
  0xa9   : > { %v271_v25 = vadd.f32 %v267_v24, %v231_v23 }
  0xab   : > { %274 = vst.msk [vmem:[%s150_s20 + $0x8] sm:$0xff] %vm272_vm4, %v271_v25 }
  0xac   : > { %474 = shalt.err (!%p471_p5)
}
  0xad   : > { %s527_s4 = smov 128   ;;  %s528_s5 = smov 8  }
  0xae   : > { %390 = dma.vmem_to_hbm [thread:$0]  (%p584_p4), %s291_s23, 256, %s293_s24, %s276_s12, %s527_s4, %s527_s4, %s528_s5  }
  0xaf PF: > { %p396_p6 = scmp.ge.s32.totalorder %s525_s14, 2  ;;  %s307_s6 = sand.u32 1, %s505_s9  }
  0xb0   : > { %s308_s7 = scalar_lea.sflag [#allocation3], %s307_s6 }
  0xb1   : > { %p393_p7 = pnand %p396_p6, %p591_p8 }
  0xb3   : > { %p394_p9 = pneg %p393_p7 }
  0xb5   : > { %500 = dma.done.wait (%p394_p9), %s308_s7, 256  }
  0xb6   : > { %502 = vsyncadd (%p394_p9), %s308_s7, 4294967040  ;;  %s15_s14 = sadd.s32 1, %s525_s14   ;;  %s663_s9 = smov %s509_s10 }
  0xb7   : > { %p12_p10 = scmp.ge.s32.totalorder %s15_s14, 4   ;;  %s664_s10 = smov %s513_s11 }
  0xb8   : > { %s665_s11 = smov %s597_s22  ;;  %s666_s12 = smov %s521_s13 }
  0xb9   : > { %s667_s13 = smov %s669_s17  ;;  %14 = sbr.rel (!%p12_p10) target bundleno = 4 (0x4), region = 63 }
  0xbe   :  { %314 = vsyncpa [#allocation3], 1 }
  0xbf   :  { %316 = vsyncpa [#allocation3 + $0x1], 1 }

</bundles_post_ra>
